<compile_context>
chip_gen: v7x
topology: tpu7x:2x2x1
jax: 0.10.0
libtpu: 0.0.40
codegen_flags: <defaults>
</compile_context>

<pallas_src>
import math

import jax
import jax.numpy as jnp
from jax.experimental import pallas as pl
from jax.experimental.pallas import tpu as pltpu

NEG = -1e30


def _round_up(a, b):
    return (a + b - 1) // b * b


def _make_aam_kernel(cos_m, sin_m, th, mm, scale):
    """AAM-softmax CE + top-1 hit, tiled over classes with online softmax."""

    def kernel(x_ref, wt_ref, lab_ref, bias_ref,
               rloss_ref, rcorr_ref,
               m_sc, l_sc, t_sc):
        k = pl.program_id(1)              # class tile (reduction, innermost)
        nc = pl.num_programs(1)

        # ---- init per-batch-tile online-softmax accumulators ----------------
        @pl.when(k == 0)
        def _():
            m_sc[...] = jnp.full(m_sc.shape, NEG, jnp.float32)
            l_sc[...] = jnp.zeros(l_sc.shape, jnp.float32)
            t_sc[...] = jnp.zeros(t_sc.shape, jnp.float32)

        lab = lab_ref[...]                                    # (Bt, 1) int32

        # cosine = x_hat . w_hat ; both operands pre-normalized bf16 (MXU).
        # TODO(synk): cosine carries bf16 mantissa error vs the f32 PyTorch
        # reference; recompute the target-row dot in f32 if bit-closeness matters.
        cosine = jnp.dot(x_ref[...], wt_ref[...],
                         preferred_element_type=jnp.float32)   # (Bt, Ct)
        bt, ct = cosine.shape

        col = jax.lax.broadcasted_iota(jnp.int32, (bt, ct), 1) + k * ct
        is_t = col == lab                                      # target column

        # ---- ArcFace margin on the target column only (easy_margin=False) ----
        cos_t = jnp.sum(jnp.where(is_t, cosine, 0.0), axis=-1, keepdims=True)
        sin_t = jnp.sqrt(jnp.clip(1.0 - cos_t * cos_t, 0.0, 1.0))
        phi_t = cos_t * cos_m - sin_t * sin_m
        phi_t = jnp.where(cos_t - th > 0.0, phi_t, cos_t - mm)
        tgt_logit = phi_t * scale                              # (Bt, 1)

        # Scaled logits; bias row is 0 for real classes, -1e30 for padded ones.
        logits = jnp.where(is_t, tgt_logit,
                           cosine * scale + bias_ref[...])     # (Bt, Ct)

        # Accumulate the target logit once (the tile that owns the label column).
        in_tile = jnp.logical_and(lab >= k * ct, lab < (k + 1) * ct)
        t_sc[...] = t_sc[...] + jnp.where(in_tile, tgt_logit, 0.0)

        # ---- online softmax ---------------------------------------------------
        tile_max = jnp.max(logits, axis=-1, keepdims=True)
        m_old = m_sc[...]
        m_new = jnp.maximum(m_old, tile_max)
        l_sc[...] = (l_sc[...] * jnp.exp(m_old - m_new)
                     + jnp.sum(jnp.exp(logits - m_new), axis=-1, keepdims=True))
        m_sc[...] = m_new

        # ---- finalize this batch tile at the last class tile ------------------
        @pl.when(k == nc - 1)
        def _():
            lse = jnp.log(l_sc[...]) + m_sc[...]
            rloss_ref[...] = lse - t_sc[...]                   # per-row CE
            # top-1 correct <=> target logit equals the global max.
            rcorr_ref[...] = jnp.where(t_sc[...] >= m_sc[...], 1.0, 0.0)

    return kernel


def _make_proto_kernel(n_real):
    """Angular-prototypical loss on pre-normalized (N_pad, D_pad) bf16 inputs."""

    def kernel(pos_ref, anc_ref, pw_ref, pb_ref, out_ref):
        cs = jax.lax.dot_general(pos_ref[...], anc_ref[...],
                                 (((1,), (1,)), ((), ())),
                                 preferred_element_type=jnp.float32)  # (Np, Np)
        lg = cs * pw_ref[0] + pb_ref[0]

        npad = lg.shape[0]
        rr = jax.lax.broadcasted_iota(jnp.int32, (npad, 1), 0)
        cc = jax.lax.broadcasted_iota(jnp.int32, (npad, npad), 1)
        lg = jnp.where(cc < n_real, lg, NEG)                  # mask padded anchors
        tgt = jnp.sum(jnp.where(cc == rr, lg, 0.0), axis=-1, keepdims=True)

        rmax = jnp.max(lg, axis=-1, keepdims=True)
        lse = jnp.log(jnp.sum(jnp.exp(lg - rmax), axis=-1, keepdims=True)) + rmax
        rvalid = (rr < n_real).astype(jnp.float32)
        out_ref[...] = jnp.sum((lse - tgt) * rvalid, axis=0,
                               keepdims=True) * (1.0 / n_real)

    return kernel


class AAmSoftmaxProto:
    """JAX/Pallas port of losses/AAmSoftmaxProto.py (forward pass only)."""

    def __init__(self, nOut, nClasses, margin=0.3, scale=15.0,
                 init_w=10.0, init_b=-5.0, key=None,
                 block_b=1024, block_c=1024):
        self.test_normalize = True
        self.nOut = nOut
        self.nClasses = nClasses
        self.s = float(scale)
        self.cos_m = math.cos(margin)
        self.sin_m = math.sin(margin)
        self.th = math.cos(math.pi - margin)
        self.mm = math.sin(math.pi - margin) * margin

        # deterministic xavier_normal_ (gain=1) init for the (nClasses, nOut) weight
        std = math.sqrt(2.0 / (nOut + nClasses))
        key = jax.random.PRNGKey(0) if key is None else key
        self.weight = std * jax.random.normal(key, (nClasses, nOut), jnp.float32)
        # angular-prototypical affine params
        self.w = jnp.array([init_w], jnp.float32)
        self.b = jnp.array([init_b], jnp.float32)

        # ---- tiling constants (lane/MXU friendly) ----
        self.block_b = _round_up(max(int(block_b), 8), 8)
        self.block_c = _round_up(max(int(block_c), 128), 128)
        self._D_pad = _round_up(nOut, 128)
        self._Ct = min(self.block_c, _round_up(nClasses, 128))
        self._C_pad = _round_up(nClasses, self._Ct)

        # Pre-normalized, transposed, padded bf16 classifier weight (1/||w||
        # folded in once at init) — the single HBM stream the kernel consumes.
        w_norm = jnp.sqrt(jnp.sum(self.weight * self.weight, axis=-1,
                                  keepdims=True))
        w_n = self.weight / jnp.maximum(w_norm, 1e-12)         # F.normalize eps
        w_pad = jnp.zeros((self._C_pad, self._D_pad), jnp.float32)
        w_pad = w_pad.at[:nClasses, :nOut].set(w_n)
        self._w_t = jnp.transpose(w_pad).astype(jnp.bfloat16)  # (D_pad, C_pad)

        # Additive bias row masking the padded classes (0 real, -1e30 pad).
        self._bias = jnp.full((1, self._C_pad), NEG, jnp.float32)
        self._bias = self._bias.at[0, :nClasses].set(0.0)

    def __call__(self, x, label=None):
        assert x.shape[1] == 2
        N, M, D = x.shape
        assert D == self.nOut
        B = N * M

        x = x.astype(jnp.float32)
        x_flat = x.reshape(B, D)
        lab = jnp.repeat(label.astype(jnp.int32), M)   # label.repeat_interleave(2)

        D_pad, Ct, C_pad = self._D_pad, self._Ct, self._C_pad
        Bt = min(self.block_b, _round_up(B, 8))        # default: nb == 1
        B_pad = _round_up(B, Bt)
        nb, nc = B_pad // Bt, C_pad // Ct

        # L2-normalize rows once in f32, cast to bf16 (MXU operand), pad.
        inv_xn = jax.lax.rsqrt(
            jnp.maximum(jnp.sum(x_flat * x_flat, axis=-1, keepdims=True), 1e-24))
        xn = (x_flat * inv_xn).astype(jnp.bfloat16)
        xf = jnp.zeros((B_pad, D_pad), jnp.bfloat16).at[:B, :D].set(xn)
        lab2 = jnp.zeros((B_pad, 1), jnp.int32).at[:B, 0].set(lab)

        aam_kernel = _make_aam_kernel(self.cos_m, self.sin_m, self.th,
                                      self.mm, self.s)

        row_loss, row_corr = pl.pallas_call(
            aam_kernel,
            out_shape=(jax.ShapeDtypeStruct((B_pad, 1), jnp.float32),
                       jax.ShapeDtypeStruct((B_pad, 1), jnp.float32)),
            grid=(nb, nc),
            in_specs=[
                pl.BlockSpec((Bt, D_pad), lambda i, k: (i, 0)),   # x (bf16, normed)
                pl.BlockSpec((D_pad, Ct), lambda i, k: (0, k)),   # W^T (bf16, normed)
                pl.BlockSpec((Bt, 1), lambda i, k: (i, 0)),       # labels
                pl.BlockSpec((1, Ct), lambda i, k: (0, k)),       # pad-mask bias
            ],
            out_specs=(
                pl.BlockSpec((Bt, 1), lambda i, k: (i, 0)),       # per-row CE
                pl.BlockSpec((Bt, 1), lambda i, k: (i, 0)),       # per-row top-1 hit
            ),
            scratch_shapes=[
                pltpu.VMEM((Bt, 1), jnp.float32),    # running max
                pltpu.VMEM((Bt, 1), jnp.float32),    # running sum-exp
                pltpu.VMEM((Bt, 1), jnp.float32),    # target logit
            ],
            compiler_params=pltpu.CompilerParams(
                dimension_semantics=("parallel", "arbitrary"),
                vmem_limit_bytes=64 * 1024 * 1024,
            ),
        )(xf, self._w_t, lab2, self._bias)

        nlossS = jnp.sum(row_loss[:B, 0]) * (1.0 / B)          # mean CE
        prec1 = jnp.sum(row_corr[:B, 0]) * (100.0 / B)         # top-1 %

        # ---- angular-prototypical branch (separate tiny kernel) --------------
        N_pad = _round_up(N, 8)
        pos = x[:, 0, :]
        anc = jnp.mean(x[:, 1:, :], axis=1)
        inv_p = jax.lax.rsqrt(
            jnp.maximum(jnp.sum(pos * pos, axis=-1, keepdims=True), 1e-24))
        inv_a = jax.lax.rsqrt(
            jnp.maximum(jnp.sum(anc * anc, axis=-1, keepdims=True), 1e-24))
        pos_n = jnp.zeros((N_pad, D_pad), jnp.bfloat16).at[:N, :D].set(
            (pos * inv_p).astype(jnp.bfloat16))
        anc_n = jnp.zeros((N_pad, D_pad), jnp.bfloat16).at[:N, :D].set(
            (anc * inv_a).astype(jnp.bfloat16))
        pw = jnp.maximum(self.w, 1e-6)       # torch.clamp(self.w, 1e-6)

        proto = pl.pallas_call(
            _make_proto_kernel(N),
            out_shape=jax.ShapeDtypeStruct((1, 1), jnp.float32),
            grid=(1,),
            in_specs=[
                pl.BlockSpec((N_pad, D_pad), lambda i: (0, 0)),   # positives
                pl.BlockSpec((N_pad, D_pad), lambda i: (0, 0)),   # anchors
                pl.BlockSpec(memory_space=pltpu.SMEM),            # proto w (clamped)
                pl.BlockSpec(memory_space=pltpu.SMEM),            # proto b
            ],
            out_specs=pl.BlockSpec((1, 1), lambda i: (0, 0)),
        )(pos_n, anc_n, pw, self.b)
        nlossP = proto[0, 0]

        return nlossS + nlossP, prec1


if __name__ == "__main__":
    key = jax.random.PRNGKey(0)
    kx, kl, kw = jax.random.split(key, 3)

    # Small shapes that still exercise D padding (64 -> 128), multiple batch
    # tiles (B=16, Bt=8) and multiple / padded class tiles (C=300 -> 3 x 128).
    N, M, D, C = 8, 2, 64, 300
    x = jax.random.normal(kx, (N, M, D), jnp.float32)
    label = jax.random.randint(kl, (N,), 0, C, dtype=jnp.int32)

    loss_fn = AAmSoftmaxProto(nOut=D, nClasses=C, margin=0.3, scale=15.0,
                              key=kw, block_b=8, block_c=128)
    total_loss, prec1 = loss_fn(x, label)
    jax.block_until_ready((total_loss, prec1))
    assert bool(jnp.isfinite(total_loss)) and bool(jnp.isfinite(prec1))
    print("KERNEL_OK")
</pallas_src>

<mosaic_0001>
module attributes {stable_mosaic.version = 11 : i64} {
  func.func @kernel(%arg0: i32, %arg1: i32, %arg2: memref<8x128xbf16, #tpu.memory_space<vmem>>, %arg3: memref<128x128xbf16, #tpu.memory_space<vmem>>, %arg4: memref<8x1xi32, #tpu.memory_space<vmem>>, %arg5: memref<1x128xf32, #tpu.memory_space<vmem>>, %arg6: memref<8x1xf32, #tpu.memory_space<vmem>>, %arg7: memref<8x1xf32, #tpu.memory_space<vmem>>, %arg8: memref<8x1xf32, #tpu.memory_space<vmem>>, %arg9: memref<8x1xf32, #tpu.memory_space<vmem>>, %arg10: memref<8x1xf32, #tpu.memory_space<vmem>>) attributes {dimension_semantics = [#tpu.dimension_semantics<parallel>, #tpu.dimension_semantics<arbitrary>], iteration_bounds = array<i64: 2, 3>, scalar_prefetch = 0 : i64, scratch_operands = 3 : i64, tpu.core_type = #tpu.core_type<tc>, window_params = [{transform_indices = @transform_0, window_bounds = array<i64: 8, 128>}, {transform_indices = @transform_1, window_bounds = array<i64: 128, 128>}, {transform_indices = @transform_2, window_bounds = array<i64: 8, 1>}, {transform_indices = @transform_3, window_bounds = array<i64: 1, 128>}, {transform_indices = @transform_4, window_bounds = array<i64: 8, 1>}, {transform_indices = @transform_5, window_bounds = array<i64: 8, 1>}]} {
    %c0_i32 = arith.constant 0 : i32
    %0 = arith.cmpi eq, %arg1, %c0_i32 : i32
    %1 = arith.extui %0 : i1 to i32
    %c0_i32_0 = arith.constant 0 : i32
    %2 = arith.cmpi ne, %1, %c0_i32_0 : i32
    scf.if %2 {
      %cst_38 = arith.constant -1.000000e+30 : f32
      %79 = vector.broadcast %cst_38 : f32 to vector<8x1xf32>
      %c0_39 = arith.constant 0 : index
      %c0_40 = arith.constant 0 : index
      %80 = vector.load %arg8[%c0_39, %c0_40] : memref<8x1xf32, #tpu.memory_space<vmem>>, vector<8x1xf32>
      tpu.vector_store %arg8[%c0_39, %c0_40], %79 {strides = array<i32>} : memref<8x1xf32, #tpu.memory_space<vmem>>, vector<8x1xf32>,
      %cst_41 = arith.constant 0.000000e+00 : f32
      %81 = vector.broadcast %cst_41 : f32 to vector<8x1xf32>
      %c0_42 = arith.constant 0 : index
      %c0_43 = arith.constant 0 : index
      %82 = vector.load %arg9[%c0_42, %c0_43] : memref<8x1xf32, #tpu.memory_space<vmem>>, vector<8x1xf32>
      tpu.vector_store %arg9[%c0_42, %c0_43], %81 {strides = array<i32>} : memref<8x1xf32, #tpu.memory_space<vmem>>, vector<8x1xf32>,
      %cst_44 = arith.constant 0.000000e+00 : f32
      %83 = vector.broadcast %cst_44 : f32 to vector<8x1xf32>
      %c0_45 = arith.constant 0 : index
      %c0_46 = arith.constant 0 : index
      %84 = vector.load %arg10[%c0_45, %c0_46] : memref<8x1xf32, #tpu.memory_space<vmem>>, vector<8x1xf32>
      tpu.vector_store %arg10[%c0_45, %c0_46], %83 {strides = array<i32>} : memref<8x1xf32, #tpu.memory_space<vmem>>, vector<8x1xf32>,
    } else {
    }
    %c0 = arith.constant 0 : index
    %c0_1 = arith.constant 0 : index
    %3 = vector.load %arg4[%c0, %c0_1] : memref<8x1xi32, #tpu.memory_space<vmem>>, vector<8x1xi32>
    %c0_2 = arith.constant 0 : index
    %c0_3 = arith.constant 0 : index
    %4 = vector.load %arg2[%c0_2, %c0_3] : memref<8x128xbf16, #tpu.memory_space<vmem>>, vector<8x128xbf16>
    %c0_4 = arith.constant 0 : index
    %c0_5 = arith.constant 0 : index
    %5 = vector.load %arg3[%c0_4, %c0_5] : memref<128x128xbf16, #tpu.memory_space<vmem>>, vector<128x128xbf16>
    %cst = arith.constant dense<0.000000e+00> : vector<8x128xf32>
    %6 = tpu.matmul %4, %5, %cst {dimension_numbers = #tpu.dot_dimension_numbers<[1], [0], [0], [1], [0, 0, 1, 1], [], []>} : vector<8x128xbf16>, vector<128x128xbf16>, vector<8x128xf32> -> vector<8x128xf32>
    %7 = tpu.iota {dimensions = array<i32: 1>} : vector<8x128xi32>
    %c128_i32 = arith.constant 128 : i32
    %8 = arith.muli %arg1, %c128_i32 : i32
    %9 = vector.broadcast %8 : i32 to vector<8x128xi32>
    %10 = arith.addi %7, %9 : vector<8x128xi32>
    %11 = vector.broadcast %3 : vector<8x1xi32> to vector<8x128xi32>
    %12 = arith.cmpi eq, %10, %11 : vector<8x128xi32>
    %cst_6 = arith.constant 0.000000e+00 : f32
    %13 = vector.broadcast %cst_6 : f32 to vector<8x128xf32>
    %14 = arith.select %12, %6, %13 : vector<8x128xi1>, vector<8x128xf32>
    %cst_7 = arith.constant dense<0.000000e+00> : vector<8xf32>
    %15 = vector.multi_reduction <add>, %14, %cst_7 [1] : vector<8x128xf32> to vector<8xf32>
    %16 = vector.shape_cast %15 : vector<8xf32> to vector<8x1xf32>
    %17 = arith.mulf %16, %16 : vector<8x1xf32>
    %cst_8 = arith.constant 1.000000e+00 : f32
    %18 = vector.broadcast %cst_8 : f32 to vector<8x1xf32>
    %19 = arith.subf %18, %17 : vector<8x1xf32>
    %cst_9 = arith.constant 0.000000e+00 : f32
    %cst_10 = arith.constant 1.000000e+00 : f32
    %20 = vector.broadcast %cst_9 : f32 to vector<8x1xf32>
    %21 = arith.maximumf %20, %19 : vector<8x1xf32>
    %22 = vector.broadcast %cst_10 : f32 to vector<8x1xf32>
    %23 = arith.minimumf %22, %21 : vector<8x1xf32>
    %24 = math.sqrt %23 : vector<8x1xf32>
    %cst_11 = arith.constant 0.955336511 : f32
    %25 = vector.broadcast %cst_11 : f32 to vector<8x1xf32>
    %26 = arith.mulf %16, %25 : vector<8x1xf32>
    %cst_12 = arith.constant 0.295520216 : f32
    %27 = vector.broadcast %cst_12 : f32 to vector<8x1xf32>
    %28 = arith.mulf %24, %27 : vector<8x1xf32>
    %29 = arith.subf %26, %28 : vector<8x1xf32>
    %cst_13 = arith.constant -0.955336511 : f32
    %30 = vector.broadcast %cst_13 : f32 to vector<8x1xf32>
    %31 = arith.subf %16, %30 : vector<8x1xf32>
    %cst_14 = arith.constant 0.000000e+00 : f32
    %32 = vector.broadcast %cst_14 : f32 to vector<8x1xf32>
    %33 = arith.cmpf ogt, %31, %32 : vector<8x1xf32>
    %cst_15 = arith.constant 0.0886560603 : f32
    %34 = vector.broadcast %cst_15 : f32 to vector<8x1xf32>
    %35 = arith.subf %16, %34 : vector<8x1xf32>
    %36 = arith.select %33, %29, %35 : vector<8x1xi1>, vector<8x1xf32>
    %cst_16 = arith.constant 1.500000e+01 : f32
    %37 = vector.broadcast %cst_16 : f32 to vector<8x1xf32>
    %38 = arith.mulf %36, %37 : vector<8x1xf32>
    %cst_17 = arith.constant 1.500000e+01 : f32
    %39 = vector.broadcast %cst_17 : f32 to vector<8x128xf32>
    %40 = arith.mulf %6, %39 : vector<8x128xf32>
    %c0_18 = arith.constant 0 : index
    %c0_19 = arith.constant 0 : index
    %41 = vector.load %arg5[%c0_18, %c0_19] : memref<1x128xf32, #tpu.memory_space<vmem>>, vector<1x128xf32>
    %42 = vector.broadcast %41 : vector<1x128xf32> to vector<8x128xf32>
    %43 = arith.addf %40, %42 : vector<8x128xf32>
    %44 = vector.shape_cast %38 : vector<8x1xf32> to vector<8x1xf32>
    %45 = vector.broadcast %44 : vector<8x1xf32> to vector<8x128xf32>
    %46 = arith.select %12, %45, %43 : vector<8x128xi1>, vector<8x128xf32>
    %c128_i32_20 = arith.constant 128 : i32
    %47 = arith.muli %arg1, %c128_i32_20 : i32
    %48 = vector.broadcast %47 : i32 to vector<8x1xi32>
    %49 = arith.cmpi sge, %3, %48 : vector<8x1xi32>
    %c1_i32 = arith.constant 1 : i32
    %50 = arith.addi %arg1, %c1_i32 : i32
    %c128_i32_21 = arith.constant 128 : i32
    %51 = arith.muli %50, %c128_i32_21 : i32
    %52 = vector.broadcast %51 : i32 to vector<8x1xi32>
    %53 = arith.cmpi slt, %3, %52 : vector<8x1xi32>
    %54 = arith.andi %49, %53 : vector<8x1xi1>
    %c0_22 = arith.constant 0 : index
    %c0_23 = arith.constant 0 : index
    %55 = vector.load %arg10[%c0_22, %c0_23] : memref<8x1xf32, #tpu.memory_space<vmem>>, vector<8x1xf32>
    %cst_24 = arith.constant 0.000000e+00 : f32
    %56 = vector.broadcast %cst_24 : f32 to vector<8x1xf32>
    %57 = arith.select %54, %38, %56 : vector<8x1xi1>, vector<8x1xf32>
    %58 = arith.addf %55, %57 : vector<8x1xf32>
    %c0_25 = arith.constant 0 : index
    %c0_26 = arith.constant 0 : index
    %59 = vector.load %arg10[%c0_25, %c0_26] : memref<8x1xf32, #tpu.memory_space<vmem>>, vector<8x1xf32>
    tpu.vector_store %arg10[%c0_25, %c0_26], %58 {strides = array<i32>} : memref<8x1xf32, #tpu.memory_space<vmem>>, vector<8x1xf32>,
    %cst_27 = arith.constant dense<0xFF800000> : vector<8xf32>
    %60 = vector.multi_reduction <maximumf>, %46, %cst_27 [1] : vector<8x128xf32> to vector<8xf32>
    %61 = vector.shape_cast %60 : vector<8xf32> to vector<8x1xf32>
    %c0_28 = arith.constant 0 : index
    %c0_29 = arith.constant 0 : index
    %62 = vector.load %arg8[%c0_28, %c0_29] : memref<8x1xf32, #tpu.memory_space<vmem>>, vector<8x1xf32>
    %63 = arith.maximumf %62, %61 : vector<8x1xf32>
    %c0_30 = arith.constant 0 : index
    %c0_31 = arith.constant 0 : index
    %64 = vector.load %arg9[%c0_30, %c0_31] : memref<8x1xf32, #tpu.memory_space<vmem>>, vector<8x1xf32>
    %65 = arith.subf %62, %63 : vector<8x1xf32>
    %66 = math.exp %65 : vector<8x1xf32>
    %67 = arith.mulf %64, %66 : vector<8x1xf32>
    %68 = vector.broadcast %63 : vector<8x1xf32> to vector<8x128xf32>
    %69 = arith.subf %46, %68 : vector<8x128xf32>
    %70 = math.exp %69 : vector<8x128xf32>
    %cst_32 = arith.constant dense<0.000000e+00> : vector<8xf32>
    %71 = vector.multi_reduction <add>, %70, %cst_32 [1] : vector<8x128xf32> to vector<8xf32>
    %72 = vector.shape_cast %71 : vector<8xf32> to vector<8x1xf32>
    %73 = arith.addf %67, %72 : vector<8x1xf32>
    %c0_33 = arith.constant 0 : index
    %c0_34 = arith.constant 0 : index
    %74 = vector.load %arg9[%c0_33, %c0_34] : memref<8x1xf32, #tpu.memory_space<vmem>>, vector<8x1xf32>
    tpu.vector_store %arg9[%c0_33, %c0_34], %73 {strides = array<i32>} : memref<8x1xf32, #tpu.memory_space<vmem>>, vector<8x1xf32>,
    %c0_35 = arith.constant 0 : index
    %c0_36 = arith.constant 0 : index
    %75 = vector.load %arg8[%c0_35, %c0_36] : memref<8x1xf32, #tpu.memory_space<vmem>>, vector<8x1xf32>
    tpu.vector_store %arg8[%c0_35, %c0_36], %63 {strides = array<i32>} : memref<8x1xf32, #tpu.memory_space<vmem>>, vector<8x1xf32>,
    %c2_i32 = arith.constant 2 : i32
    %76 = arith.cmpi eq, %arg1, %c2_i32 : i32
    %77 = arith.extui %76 : i1 to i32
    %c0_i32_37 = arith.constant 0 : i32
    %78 = arith.cmpi ne, %77, %c0_i32_37 : i32
    scf.if %78 {
      %c0_38 = arith.constant 0 : index
      %c0_39 = arith.constant 0 : index
      %79 = vector.load %arg9[%c0_38, %c0_39] : memref<8x1xf32, #tpu.memory_space<vmem>>, vector<8x1xf32>
      %80 = math.log %79 : vector<8x1xf32>
      %c0_40 = arith.constant 0 : index
      %c0_41 = arith.constant 0 : index
      %81 = vector.load %arg8[%c0_40, %c0_41] : memref<8x1xf32, #tpu.memory_space<vmem>>, vector<8x1xf32>
      %82 = arith.addf %80, %81 : vector<8x1xf32>
      %c0_42 = arith.constant 0 : index
      %c0_43 = arith.constant 0 : index
      %83 = vector.load %arg10[%c0_42, %c0_43] : memref<8x1xf32, #tpu.memory_space<vmem>>, vector<8x1xf32>
      %84 = arith.subf %82, %83 : vector<8x1xf32>
      %c0_44 = arith.constant 0 : index
      %c0_45 = arith.constant 0 : index
      %85 = vector.load %arg6[%c0_44, %c0_45] : memref<8x1xf32, #tpu.memory_space<vmem>>, vector<8x1xf32>
      tpu.vector_store %arg6[%c0_44, %c0_45], %84 {strides = array<i32>} : memref<8x1xf32, #tpu.memory_space<vmem>>, vector<8x1xf32>,
      %c0_46 = arith.constant 0 : index
      %c0_47 = arith.constant 0 : index
      %86 = vector.load %arg10[%c0_46, %c0_47] : memref<8x1xf32, #tpu.memory_space<vmem>>, vector<8x1xf32>
      %c0_48 = arith.constant 0 : index
      %c0_49 = arith.constant 0 : index
      %87 = vector.load %arg8[%c0_48, %c0_49] : memref<8x1xf32, #tpu.memory_space<vmem>>, vector<8x1xf32>
      %88 = arith.cmpf oge, %86, %87 : vector<8x1xf32>
      %cst_50 = arith.constant 1.000000e+00 : f32
      %cst_51 = arith.constant 0.000000e+00 : f32
      %89 = vector.broadcast %cst_50 : f32 to vector<8x1xf32>
      %90 = vector.broadcast %cst_51 : f32 to vector<8x1xf32>
      %91 = arith.select %88, %89, %90 : vector<8x1xi1>, vector<8x1xf32>
      %c0_52 = arith.constant 0 : index
      %c0_53 = arith.constant 0 : index
      %92 = vector.load %arg7[%c0_52, %c0_53] : memref<8x1xf32, #tpu.memory_space<vmem>>, vector<8x1xf32>
      tpu.vector_store %arg7[%c0_52, %c0_53], %91 {strides = array<i32>} : memref<8x1xf32, #tpu.memory_space<vmem>>, vector<8x1xf32>,
    } else {
    }
    return
  }
  func.func @transform_0(%arg0: i32, %arg1: i32) -> (i32, i32) {
    %c0_i32 = arith.constant 0 : i32
    %c0_i32_0 = arith.constant 0 : i32
    return %arg0, %c0_i32 : i32, i32
  }
  func.func @transform_1(%arg0: i32, %arg1: i32) -> (i32, i32) {
    %c0_i32 = arith.constant 0 : i32
    %c0_i32_0 = arith.constant 0 : i32
    return %c0_i32, %arg1 : i32, i32
  }
  func.func @transform_2(%arg0: i32, %arg1: i32) -> (i32, i32) {
    %c0_i32 = arith.constant 0 : i32
    %c0_i32_0 = arith.constant 0 : i32
    return %arg0, %c0_i32 : i32, i32
  }
  func.func @transform_3(%arg0: i32, %arg1: i32) -> (i32, i32) {
    %c0_i32 = arith.constant 0 : i32
    %c0_i32_0 = arith.constant 0 : i32
    return %c0_i32, %arg1 : i32, i32
  }
  func.func @transform_4(%arg0: i32, %arg1: i32) -> (i32, i32) {
    %c0_i32 = arith.constant 0 : i32
    %c0_i32_0 = arith.constant 0 : i32
    return %arg0, %c0_i32 : i32, i32
  }
  func.func @transform_5(%arg0: i32, %arg1: i32) -> (i32, i32) {
    %c0_i32 = arith.constant 0 : i32
    %c0_i32_0 = arith.constant 0 : i32
    return %arg0, %c0_i32 : i32, i32
  }
}

</mosaic_0001>

<bundles_post_ra>
// kernel: tpu_custom_call.1
= control target key start
LH: loop header
LB: loop body
LE: loop exit
PB: predicated region body
PF: predicated region fallthrough
CT: control target
= control target key end

     0   :  { %s1785_s0 = inlined_call_operand.hbm [shape: bf16[16,128], index: 0, kind: input, shape index: {}]   ;;  %s1786_s1 = inlined_call_operand.hbm [shape: bf16[128,384], index: 1, kind: input, shape index: {}]   ;;  %s1787_s2 = inlined_call_operand.hbm [shape: s32[16,1], index: 2, kind: input, shape index: {}]   ;;  %s1788_s3 = inlined_call_operand.hbm [shape: f32[1,384], index: 3, kind: input, shape index: {}]   ;;  %s1789_s4 = inlined_call_operand.hbm [shape: f32[16,1], index: 4, kind: output, shape index: {0}]   ;;  %s1790_s5 = inlined_call_operand.hbm [shape: f32[16,1], index: 5, kind: output, shape index: {1}]  }
   0x1   :  { %1807 = sst [smem:[#allocation30_spill]] %s1786_s1 }
   0x2   :  { %1808 = sst [smem:[#allocation31_spill]] %s1789_s4 }
   0x3   :  { %1809 = sst [smem:[#allocation32_spill]] %s1790_s5 }
   0x4   :  { %11 = vsyncpa [#allocation6], 0 }
   0x5   :  { %13 = vsyncpa [#allocation6 + $0x1], 0 }
   0x6   :  { %14 = vsyncpa [#allocation9], 0 }
   0x7   :  { %16 = vsyncpa [#allocation9 + $0x1], 0 }
   0x8   :  { %17 = vsyncpa [#allocation12], 0 }
   0x9   :  { %19 = vsyncpa [#allocation12 + $0x1], 0 }
   0xa   :  { %20 = vsyncpa [#allocation7], 0 }
   0xb   :  { %22 = vsyncpa [#allocation7 + $0x1], 0 }
   0xc   :  { %23 = vsyncpa [#allocation15], 0 }
   0xd   :  { %25 = vsyncpa [#allocation15 + $0x1], 0  ;;  %s1335_s18 = smov 0   ;;  %s1337_s19 = smov 0  }
   0xe   :  { %s1339_s20 = smov 0   ;;  %s1341_s21 = smov 0  }
   0xf   :  { %s1343_s22 = smov 0   ;;  %s1345_s23 = smov 0  }
  0x10   :  { %s1347_s24 = smov 0   ;;  %s1349_s25 = smov 0  }
  0x11   :  { %s1351_s26 = smov 0   ;;  %s1353_s27 = smov 0  }
  0x12   :  { %s1355_s28 = smov 0  }
  0x13 LB: > { %1810 = sst [smem:[#allocation22_spill]] %s1256_s20  ;;  %s40_s29 = sadd.s32 1, %s1280_s26  ;;  %s1288_s28 = sphi %s1355_s28, %s31_s28   ;;  %s1284_s27 = sphi %s1353_s27, %s1860_s27   ;;  %s1280_s26 = sphi %s1351_s26, %s1859_s26   ;;  %s1276_s25 = sphi %s1349_s25, %s1858_s25   ;;  %s1272_s24 = sphi %s1347_s24, %s1857_s24   ;;  %s1268_s23 = sphi %s1345_s23, %s1856_s23   ;;  %s1264_s22 = sphi %s1343_s22, %s1855_s22   ;;  %s1260_s21 = sphi %s1341_s21, %s1854_s21   ;;  %s1256_s20 = sphi %s1339_s20, %s1847_s20   ;;  %s1252_s19 = sphi %s1337_s19, %s1853_s19   ;;  %s1248_s18 = sphi %s1335_s18, %s1852_s18  }
  0x14   : > { %1811 = sst [smem:[#allocation23_spill]] %s1260_s21  ;;  %p1794_p0 = scmp.eq.s32.totalorder %s1288_s28, 0 }
  0x15   : > { %1812 = sst [smem:[#allocation24_spill]] %s1268_s23  ;;  %p1392_p1 = scmp.ge.s32.totalorder %s40_s29, 3 }
  0x16   : > { %s76_s6 = sadd.s32 1, %s1256_s20  ;;  %p83_p2 = scmp.ne.s32.totalorder %s1256_s20, %s1252_s19 }
  0x17   : > { %s1862_s29 = smov (%p1392_p1, %s40_s29), 0  ;;  %p1793_p4 = scmp.lt.s32.totalorder %s1288_s28, 6 }
  0x18   : > { %1814 = sst [smem:[#allocation25_spill]] %s1862_s29  ;;  %p85_p3 = por %p83_p2, %p1794_p0 }
  0x19   : > { %s73_s7 = ssub.s32 %s1280_s26, %s1862_s29  ;;  %s235_s8 = sand.u32 1, %s1288_s28  }
  0x1a   : > { %p74_p5 = scmp.eq.s32.totalorder %s73_s7, 0  ;;  %s1410_s9 = sand.u32 1, %s1256_s20  }
  0x1b   : > { %s791_s10 = sshll.u32 %s1280_s26, 6  ;;  %s790_s12 = sshll.u32 %s1410_s9, 6 }
  0x1c   : > { %s1414_s11 = scalar_select %p74_p5, %s1256_s20, %s76_s6  }
  0x1d   : > { %s1816_s1 = sld [smem:[#allocation30_spill]]  ;;  %p1424_p6 = pnand %p1793_p4, %p85_p3 }
  0x1e   : > { %1815 = sst [smem:[#allocation26_spill]] %s1414_s11  ;;  %s239_s17 = scalar_lea.vmem [#allocation8], %s790_s12 }
  0x1f   : > { %s1817_s16 = scalar_select %p1424_p6, 1, 0 }
  0x20   : > { %s245_s6 = sshll.u32 %s239_s17, 4  ;;  %s1430_s7 = scalar_lea.sflag [#allocation9], %s235_s8  ;;  %s1428_s6 = int_to_ptr.vmem [resolvable:$true] %s245_s6 }
  0x21   : > { %p1795_p8 = pneg %p1424_p6 }
  0x23   : > { %s1420_s15 = scalar_lea.hbm %s1816_s1, %s791_s10  ;;  %s1007_s29 = scalar_lea.hbm %s1816_s1, 3072 }
  0x24   : > { %s1002_s13 = scalar_lea.hbm %s1420_s15, 1024  ;;  %p1008_p11 = scmp.lt.u32.totalorder %s1420_s15, %s1816_s1 }
  0x25   : > { %p1003_p7 = scmp.ne.s32.totalorder %s1420_s15, %s1002_s13  ;;  %p1009_p12 = scmp.lt.u32.totalorder %s1007_s29, %s1002_s13 }
  0x26   : > { %p1011_p2 = scmp.lt.u32.totalorder %s1002_s13, %s1420_s15 }
  0x27   : > { %p1005_p9 = pnand %p1795_p8, %p1003_p7  ;;  %p1010_p13 = por %p1009_p12, %p1008_p11 }
  0x29   : > { %p1006_p10 = pneg %p1005_p9  ;;  %p1012_p3 = por %p1011_p2, %p1010_p13 }
  0x2b   : > { %p1013_p5 = pnand %p1012_p3, %p1006_p10 }
  0x2d   : > { %1016 = shalt.err (!%p1013_p5)
}
  0x2e   : > { %s1017_s8 = scalar_lea.vmem %s1428_s6, 1024  ;;  %s1290_s12 = smov [#allocation8]  }
  0x2f   : > { %p1018_p7 = scmp.ne.s32.totalorder %s1428_s6, %s1017_s8  ;;  %s1022_s17 = sshll.u32 %s1290_s12, 4  ;;  %s1023_s17 = int_to_ptr.vmem [resolvable:$false] %s1022_s17 }
  0x30   : > { %s1024_s20 = scalar_lea.vmem %s1023_s17, 2048  ;;  %p1025_p0 = scmp.lt.s32.totalorder %s1428_s6, %s1023_s17 }
  0x31   : > { %p1020_p9 = pnand %p1018_p7, %p1795_p8  ;;  %p1026_p11 = scmp.lt.s32.totalorder %s1024_s20, %s1017_s8 }
  0x33   : > { %p1021_p4 = pneg %p1020_p9  ;;  %p1027_p12 = por %p1026_p11, %p1025_p0 }
  0x35   : > { %p1028_p13 = pnand %p1027_p12, %p1021_p4 }
  0x37   : > { %1031 = shalt.err (!%p1028_p13)
}
  0x38   : > { %s1291_s29 = smov 192   ;;  %s1292_s11 = smov 64  }
  0x39   : > { %s1293_s13 = smov 4   ;;  %p795_p0 = scmp.ge.s32.totalorder %s1288_s28, 1 }
  0x3a   : > { %871 = dma.hbm_to_vmem [thread:$0]  (!%p1424_p6), %s1420_s15, 1024, %s1428_s6, %s1430_s7, %s1291_s29, %s1292_s11, %s1293_s13  }
  0x3b   : > { %p288_p4 = scmp.lt.s32.totalorder %s1288_s28, 7  ;;  %s1465_s14 = sadd.s32 4294967295, %s1288_s28  }
  0x3c   : > { %s785_s8 = sadd.s32 4294967294, %s1288_s28   ;;  %s43_s12 = sadd.s32 1, %s1284_s27 }
  0x3d   : > { %p1460_p10 = pnand %p795_p0, %p288_p4  ;;  %s1864_s12 = smov (!%p1392_p1, %s43_s12), %s1284_s27 }
  0x3e   : > { %s50_s17 = sadd.s32 1, %s1268_s23  ;;  %p57_p2 = scmp.ne.s32.totalorder %s1268_s23, %s1264_s22 }
  0x3f   : > { %s1818_s10 = scalar_select %p1460_p10, 1, 0 }
  0x40   : > { %p45_p3 = scmp.ge.s32.totalorder %s1864_s12, 2  ;;  %p63_p5 = scmp.ne.s32.totalorder %s1264_s22, %s1260_s21 }
  0x41   : > { %p1819_p7 = scmp.eq.s32.totalorder %s1288_s28, 0  ;;  %p64_p11 = scmp.eq.s32.totalorder %s1465_s14, 0 }
  0x42   : > { %s1866_s12 = smov (%p45_p3, %s1864_s12), 0  ;;  %p89_p12 = scmp.ne.s32.totalorder %s1252_s19, %s1248_s18 }
  0x43   : > { %p1479_p9 = por %p1819_p7, %p57_p2  ;;  %1821 = sst [smem:[#allocation27_spill]] %s1866_s12 }
  0x44   : > { %p1489_p1 = por %p64_p11, %p63_p5  ;;  %s47_s6 = ssub.s32 %s1284_s27, %s1866_s12 }
  0x45   : > { %p165_p13 = scmp.eq.s32.totalorder %s1465_s14, 5  ;;  %p48_p0 = scmp.eq.s32.totalorder %s47_s6, 0 }
  0x46   : > { %s1822_s30 = scalar_select %p1489_p1, 1, 0 }
  0x47   : > { %p1498_p4 = por %p89_p12, %p64_p11  ;;  %p1502_p7 = por %p165_p13, %p57_p2 }
  0x48   : > { %p171_p3 = scmp.eq.s32.totalorder %s785_s8, 5  ;;  %s1517_s13 = sand.u32 1, %s1268_s23  }
  0x49   : > { %s1823_s20 = scalar_select %p1498_p4, 1, 0 }
  0x4a   : > { %s1824_s29 = scalar_select %p1502_p7, 1, 0 }
  0x4b   : > { %s1507_s11 = scalar_select %p48_p0, %s1268_s23, %s50_s17  }
  0x4c   : > { %p1512_p8 = por %p171_p3, %p63_p5  ;;  %s788_s6 = sshll.u32 %s1517_s13, 2 }
  0x4d   : > { %1825 = sst [smem:[#allocation28_spill]] %s1507_s11  ;;  %s789_s1 = sshll.u32 %s1284_s27, 6 }
  0x4e   : > { %s1826_s18 = scalar_select %p1512_p8, 1, 0 }
  0x4f   : > { %s1524_s4 = scalar_lea.hbm %s1785_s0, %s789_s1  ;;  %s221_s8 = scalar_lea.vmem [#allocation5], %s788_s6 }
  0x50   : > { %1827 = sst [smem:[#allocation29_spill]] %s1826_s18  ;;  %s228_s17 = sshll.u32 %s221_s8, 4  ;;  %s1526_s17 = int_to_ptr.vmem [resolvable:$true] %s228_s17 }
  0x51   : > { %p1828_p2 = scmp.lt.s32.totalorder %s1288_s28, 6  ;;  %s793_s5 = sshll.u32 %s1284_s27, 7 }
  0x52   : > { %s218_s1 = scalar_lea.sflag [#allocation6], %s1517_s13  ;;  %s1032_s12 = scalar_lea.hbm %s1524_s4, 64 }
  0x53   : > { %p1532_p5 = pnand %p1828_p2, %p1479_p9  ;;  %p1033_p11 = scmp.ne.s32.totalorder %s1524_s4, %s1032_s12 }
  0x54   : > { %s1037_s8 = scalar_lea.hbm %s1785_s0, 128  ;;  %p1038_p9 = scmp.lt.u32.totalorder %s1524_s4, %s1785_s0 }
  0x55   : > { %p1034_p12 = pneg %p1532_p5  ;;  %p1039_p3 = scmp.lt.u32.totalorder %s1037_s8, %s1032_s12 }
  0x56   : > { %p1041_p8 = scmp.lt.u32.totalorder %s1032_s12, %s1524_s4 }
  0x57   : > { %p1035_p13 = pnand %p1034_p12, %p1033_p11  ;;  %p1040_p2 = por %p1039_p3, %p1038_p9 }
  0x59   : > { %p1036_p0 = pneg %p1035_p13  ;;  %p1042_p7 = por %p1041_p8, %p1040_p2 }
  0x5b   : > { %p1043_p4 = pnand %p1042_p7, %p1036_p0 }
  0x5d   : > { %1046 = shalt.err (!%p1043_p4)
}
  0x5e   : > { %s1047_s23 = scalar_lea.vmem %s1526_s17, 64  ;;  %s1294_s6 = smov [#allocation5]  }
  0x5f   : > { %p1048_p11 = scmp.ne.s32.totalorder %s1526_s17, %s1047_s23  ;;  %s1052_s15 = sshll.u32 %s1294_s6, 4  ;;  %s1053_s15 = int_to_ptr.vmem [resolvable:$false] %s1052_s15 }
  0x60   : > { %s1054_s21 = scalar_lea.vmem %s1053_s15, 128  ;;  %p1055_p10 = scmp.lt.s32.totalorder %s1526_s17, %s1053_s15 }
  0x61   : > { %p1050_p13 = pnand %p1048_p11, %p1034_p12  ;;  %p1056_p9 = scmp.lt.s32.totalorder %s1054_s21, %s1047_s23 }
  0x63   : > { %p1051_p1 = pneg %p1050_p13  ;;  %p1057_p3 = por %p1056_p9, %p1055_p10 }
  0x65   : > { %p1058_p8 = pnand %p1057_p3, %p1051_p1 }
  0x67   : > { %1061 = shalt.err (!%p1058_p8)
}
  0x68   : > { %868 = dma.hbm_to_vmem [thread:$0]  (!%p1532_p5), %s1524_s4, 64, %s1526_s17, %s218_s1  }
  0x69   : > { %s1569_s8 = scalar_lea.hbm %s1787_s2, %s793_s5  ;;  %s1830_s6 = sshll.u32 %s1517_s13, 3 }
  0x6a   : > { %s259_s23 = scalar_lea.vmem [#allocation10], %s1830_s6  ;;  %s1062_s21 = scalar_lea.hbm %s1569_s8, 128 }
  0x6b   : > { %s266_s15 = sshll.u32 %s259_s23, 4  ;;  %p1063_p10 = scmp.ne.s32.totalorder %s1569_s8, %s1062_s21  ;;  %s267_s15 = int_to_ptr.vmem [resolvable:$true] %s266_s15 }
  0x6c   : > { %s1067_s1 = scalar_lea.hbm %s1787_s2, 256  ;;  %p1068_p7 = scmp.lt.u32.totalorder %s1569_s8, %s1787_s2 }
  0x6d   : > { %p1065_p1 = pnand %p1063_p10, %p1034_p12  ;;  %p1069_p0 = scmp.lt.u32.totalorder %s1067_s1, %s1062_s21 }
  0x6e   : > { %p1071_p11 = scmp.lt.u32.totalorder %s1062_s21, %s1569_s8 }
  0x6f   : > { %p1066_p4 = pneg %p1065_p1  ;;  %p1070_p2 = por %p1069_p0, %p1068_p7 }
  0x71   : > { %p1072_p13 = por %p1071_p11, %p1070_p2 }
  0x73   : > { %p1073_p9 = pnand %p1072_p13, %p1066_p4 }
  0x75   : > { %1076 = shalt.err (!%p1073_p9)
}
  0x76   : > { %s1077_s13 = scalar_lea.vmem %s267_s15, 128  ;;  %s1295_s12 = smov [#allocation10]  }
  0x77   : > { %p1078_p3 = scmp.ne.s32.totalorder %s267_s15, %s1077_s13  ;;  %s1082_s6 = sshll.u32 %s1295_s12, 4  ;;  %s1083_s6 = int_to_ptr.vmem [resolvable:$false] %s1082_s6 }
  0x78   : > { %s1084_s23 = scalar_lea.vmem %s1083_s6, 256  ;;  %p1085_p1 = scmp.lt.s32.totalorder %s267_s15, %s1083_s6 }
  0x79   : > { %p1080_p8 = pnand %p1078_p3, %p1034_p12  ;;  %p1086_p6 = scmp.lt.s32.totalorder %s1084_s23, %s1077_s13 }
  0x7b   : > { %p1081_p10 = pneg %p1080_p8  ;;  %p1087_p0 = por %p1086_p6, %p1085_p1 }
  0x7d   : > { %p1088_p7 = pnand %p1087_p0, %p1081_p10 }
  0x7f   : > { %1091 = shalt.err (!%p1088_p7)
}
  0x80   : > { %874 = dma.hbm_to_vmem [thread:$0]  (!%p1532_p5), %s1569_s8, 128, %s267_s15, %s1430_s7  }
  0x81   : > { %s794_s21 = sshll.u32 %s1280_s26, 4  ;;  %s276_s5 = scalar_lea.vmem [#allocation11], %s1410_s9 }
  0x82   : > { %s1597_s1 = scalar_lea.hbm %s1788_s3, %s794_s21  ;;  %s283_s18 = sshll.u32 %s276_s5, 4  ;;  %s284_s18 = int_to_ptr.vmem [resolvable:$true] %s283_s18 }
  0x83   : > { %s274_s11 = scalar_lea.sflag [#allocation12], %s1410_s9  ;;  %s1092_s13 = scalar_lea.hbm %s1597_s1, 16 }
  0x84   : > { %p1093_p6 = scmp.ne.s32.totalorder %s1597_s1, %s1092_s13  ;;  %p1831_p12 = scmp.ne.s32.totalorder %s1817_s16, 0 }
  0x85   : > { %s1097_s15 = scalar_lea.hbm %s1788_s3, 48  ;;  %p1098_p11 = scmp.lt.u32.totalorder %s1597_s1, %s1788_s3 }
  0x86   : > { %p1832_p4 = pneg %p1831_p12  ;;  %p1099_p13 = scmp.lt.u32.totalorder %s1097_s15, %s1092_s13 }
  0x87   : > { %p1101_p3 = scmp.lt.u32.totalorder %s1092_s13, %s1597_s1 }
  0x88   : > { %p1095_p2 = pnand %p1093_p6, %p1832_p4  ;;  %p1100_p9 = por %p1099_p13, %p1098_p11 }
  0x8a   : > { %p1096_p5 = pneg %p1095_p2  ;;  %p1102_p8 = por %p1101_p3, %p1100_p9 }
  0x8c   : > { %p1103_p10 = pnand %p1102_p8, %p1096_p5 }
  0x8e   : > { %1106 = shalt.err (!%p1103_p10)
}
  0x8f   : > { %s1107_s9 = scalar_lea.vmem %s284_s18, 16  ;;  %p1833_p0 = pmov %p1832_p4 }
  0x90   : > { %p1108_p1 = scmp.ne.s32.totalorder %s284_s18, %s1107_s9  ;;  %s1296_s23 = smov [#allocation11]  }
  0x91   : > { %s1112_s21 = sshll.u32 %s1296_s23, 4  ;;  %s1113_s21 = int_to_ptr.vmem [resolvable:$false] %s1112_s21 }
  0x92   : > { %p1110_p7 = pnand %p1108_p1, %p1833_p0  ;;  %s1114_s4 = scalar_lea.vmem %s1113_s21, 32 }
  0x93   : > { %p1115_p4 = scmp.lt.s32.totalorder %s284_s18, %s1113_s21  ;;  %p1116_p2 = scmp.lt.s32.totalorder %s1114_s4, %s1107_s9 }
  0x94   : > { %p1111_p6 = pneg %p1110_p7 }
  0x95   : > { %p1117_p11 = por %p1116_p2, %p1115_p4 }
  0x97   : > { %p1118_p13 = pnand %p1117_p11, %p1111_p6 }
  0x99   : > { %1121 = shalt.err (!%p1118_p13)
}
  0x9a   : > { %877 = dma.hbm_to_vmem [thread:$0]  (!%p1831_p12), %s1597_s1, 16, %s284_s18, %s274_s11  }
  0x9b   : > { %p1834_p5 = scmp.ne.s32.totalorder %s1818_s10, 0 }
  0x9c   : > { %s1623_s17 = sand.u32 (!%p1834_p5), 1, %s1264_s22   ;;  %p1835_p9 = scmp.ne.s32.totalorder (!%p1834_p5), %s1822_s30, 0 }
  0x9d   : > { %292 = sbr.rel (%p1834_p5) target bundleno = 1111 (0x457), region = 36  ;;  %s796_s5 = sshll.u32 (!%p1834_p5), %s1623_s17, 2 }
  0x9e   : > { %s295_s13 = scalar_lea.sflag (!%p1834_p5), [#allocation6], %s1623_s17  ;;  %s1627_s7 = scalar_lea.vmem (!%p1834_p5), [#allocation5], %s796_s5 }
  0xa4   : > { %1223 = dma.done.wait (%p1835_p9), %s295_s13, 64  }
  0xa5   : > { %1225 = vsyncadd (%p1835_p9), %s295_s13, 4294967232  ;;  %s303_s16 = sand.u32 1, %s1465_s14   ;;  %s1635_s10 = sand.u32 1, %s1252_s19  }
  0xa6   : > { %s797_s1 = sshll.u32 %s1635_s10, 6  ;;  %s304_s18 = scalar_lea.sflag [#allocation9], %s303_s16 }
  0xa7   : > { %s1638_s11 = scalar_lea.vmem [#allocation8], %s797_s1  ;;  %p1836_p12 = scmp.ne.s32.totalorder %s1823_s20, 0 }
  0xa9   : > { %1227 = dma.done.wait (%p1836_p12), %s304_s18, 1024  }
  0xaa   : > { %1229 = vsyncadd (%p1836_p12), %s304_s18, 4294966272  ;;  %s1645_s8 = sshll.u32 %s1623_s17, 3 }
  0xab   : > { %s316_s15 = scalar_lea.vmem [#allocation10], %s1645_s8 }
  0xac   : > { %1231 = dma.done.wait (%p1835_p9), %s304_s18, 128  }
  0xad   : > { %1233 = vsyncadd (%p1835_p9), %s304_s18, 4294967168  ;;  %s322_s14 = scalar_lea.sflag [#allocation12], %s1635_s10  ;;  %s324_s12 = scalar_lea.vmem [#allocation11], %s1635_s10 }
  0xae   : > { %1235 = dma.done.wait (%p1836_p12), %s322_s14, 16  }
  0xaf   : > { %1237 = vsyncadd (%p1836_p12), %s322_s14, 4294967280  ;;  %s362_s6 = scalar_lea.vmem [#allocation13], %s1645_s8  ;;  %s369_s9 = scalar_lea.vmem [#allocation14], %s1645_s8 }
  0xb0   : > { %p801_p3 = scmp.ne.s32.totalorder %s1272_s24, 0 }
  0xb1   : > { %vm375_vm0 = vcmask (!%p801_p3), 7168   ;;  %v1297_v0 = vmov (!%p801_p3), -1e+30   ;;  %v1298_v1 = vmov (!%p801_p3), 0.0  }
  0xb2   : > { %374 = sbr.rel (%p801_p3) target bundleno = 185 (0xb9), region = 56  ;;  %376 = vst.msk [vmem:[#allocation2] sm:$0xff] (!%p801_p3), %vm375_vm0, %v1297_v0  ;;  %377 = vst.msk [vmem:[#allocation3] sm:$0xff] (!%p801_p3), %vm375_vm0, %v1298_v1 }
  0xb3   : > { %378 = vst.msk [vmem:[#allocation4] sm:$0xff] (!%p801_p3), %vm375_vm0, %v1298_v1 }
  0xb9 PF: > { %v986_v2 = vld [vmem:[%s1638_s11] sm:$0xff]   ;;  %v1299_v3 = vmov 0.0   ;;  %v987_v4 = vld [vmem:[%s1638_s11 + $0x8] sm:$0xff]   ;;  %vm1300_vm1 = vmmov 0   ;;  %v1301_v5 = vmov 0   ;;  %s810_s30 = sshll.u32 %s1272_s24, 7  ;;  %v485_v17 = vlaneseq }
  0xba   : > { %833 = vmatprep.subr.bf16.mxu0 %v1299_v3  ;;  %849 = vmatprep.mubr.msk.bf16.mxu0 %vm1300_vm1, %v1299_v3  ;;  %s823_s20 = sadd.s32 128, %s810_s30  ;;  %v988_v6 = vld [vmem:[%s1638_s11 + $0x10] sm:$0xff]   ;;  %v379_v8 = vld [vmem:[%s316_s15] sm:$0xff]  ;;  %v488_v9 = vstv %s810_s30  ;;  %v989_v10 = vld [vmem:[%s1638_s11 + $0x18] sm:$0xff]   ;;  %vm535_vm9 = vcmask 7168   ;;  %p815_p8 = scmp.ne.s32.totalorder %s1272_s24, 2 }
  0xbb   : > { %834 = vmatpush3.bf16.msra.mxu0 %v986_v2  ;;  %984 = vset.pattern.permute.xlu0 %v1301_v5  ;;  %v529_v7 = vstv %s823_s20  ;;  %vm526_vm3 = vcmp.ge.s32.totalorder %v379_v8, %v488_v9  ;;  %v990_v12 = vld [vmem:[%s1638_s11 + $0x20] sm:$0xff]   ;;  %v991_v13 = vld [vmem:[%s1638_s11 + $0x28] sm:$0xff]   ;;  %v992_v14 = vld [vmem:[%s1638_s11 + $0x30] sm:$0xff]   ;;  %v486_v18 = vand.u32 127, %v485_v17 }
  0xbc   : > { %835 = vmatprep.subr.bf16.mxu0 %v1299_v3  ;;  %985 = vset.pattern.permute.xlu1 %v1301_v5  ;;  %vm530_vm2 = vcmp.lt.s32.totalorder %v379_v8, %v529_v7  ;;  %v993_v15 = vld [vmem:[%s1638_s11 + $0x38] sm:$0xff]   ;;  %v813_v40 = vld [vmem:[%s324_s12] ss:$0 sm:$0xff]  ;;  %v532_v46 = vld [vmem:[#allocation4] sm:$0xff] }
  0xbd   : > { %491 = vperm.xlu0 %984, %v379_v8   ;;  %vm1668_vm4 = vmand %vm526_vm3, %vm530_vm2  ;;  %v380_v16 = vld [vmem:[%s1627_s7] sm:$0xf]  ;;  %v489_v19 = vadd.s32 %v488_v9, %v486_v18  ;;  %v539_v50 = vld [vmem:[#allocation2] sm:$0xff] }
  0xbe   : > { %v541_v60 = vld [vmem:[#allocation3] sm:$0xff] }
  0xbf   : > { %836 = vmatpush3.bf16.msra.mxu0 %v987_v4 }
  0xc0   : > { %837 = vmatprep.subr.bf16.mxu0 %v1299_v3 }
  0xc3   : > { %838 = vmatpush3.bf16.msra.mxu0 %v988_v6 }
  0xc4   : > { %839 = vmatprep.subr.bf16.mxu0 %v1299_v3 }
  0xc7   : > { %840 = vmatpush3.bf16.msra.mxu0 %v989_v10 }
  0xc8   : > { %841 = vmatprep.subr.bf16.mxu0 %v1299_v3 }
  0xcb   : > { %842 = vmatpush3.bf16.msra.mxu0 %v990_v12 }
  0xcc   : > { %843 = vmatprep.subr.bf16.mxu0 %v1299_v3 }
  0xcf   : > { %844 = vmatpush3.bf16.msra.mxu0 %v991_v13 }
  0xd0   : > { %845 = vmatprep.subr.bf16.mxu0 %v1299_v3 }
  0xd3   : > { %846 = vmatpush3.bf16.msra.mxu0 %v992_v14 }
  0xd4   : > { %847 = vmatprep.subr.bf16.mxu0 %v1299_v3  ;;  %v1302_v3 = vmov (!%p815_p8), 0.0  }
  0xd7   : > { %848 = vmatpush3.bf16.msra.mxu0 %v993_v15 }
  0xda   : > { %850 = vmatmul.mubr.bf16.vlgmr.msra.gmra.mrb[0].mxu0 %v380_v16 }
 0x13c   : > { %v492_v20 = vpop.permute.xlu0 %491 }
 0x13d   : > { %vm493_vm5 = vcmp.eq.s32.totalorder %v489_v19, %v492_v20 }
 0x1ad   : > { %v479_v21 = vpop.f32.mrb[0].mxu0 }
 0x1ae   : > { %v851_v22 = vpop.f32.mrb[1].mxu0  ;;  %v494_v23 = vsel %vm493_vm5, %v479_v21, 0.0  ;;  %v516_v39 = vmul.f32 15.0, %v479_v21 }
 0x1af   : > { %v482_v24 = vpop.f32.mrb[2].mxu0  ;;  %495 = vadd.xlane.f32.xlu0 %v494_v23 }
 0x1b0   : > { %v852_v25 = vpop.f32.mrb[3].mxu0  ;;  %v524_v44 = vadd.f32 %v813_v40, %v516_v39 }
 0x23c   : > { %v496_v26 = vpop.xlane.xlu0 %495 }
 0x23d   : > { %v497_v27 = vmul.f32 %v496_v26, %v496_v26  ;;  %v811_v36 = vadd.f32 0.9553365, %v496_v26  ;;  %v508_v37 = vmul.f32 0.9553365, %v496_v26  ;;  %v812_v42 = vadd.f32 -0.08865606, %v496_v26 }
 0x23f   : > { %v498_v28 = vsub.f32 1.0, %v497_v27  ;;  %vm512_vm8 = vcmp.gt.f32.partialorder %v811_v36, 0.0 }
 0x241   : > { %v499_v29 = vmax.f32 %v498_v28, 0.0 }
 0x243   : > { %v500_v30 = vmin.f32 %v499_v29, 1.0 }
 0x245   : > { %994 = vrsqrt.f32 %v500_v30  ;;  %vm503_vm6 = vcmp.eq.f32.partialorder %v500_v30, inf  ;;  %v506_v33 = vand.u32 2147483648, %v500_v30  ;;  %vm505_vm7 = vcmp.eq.f32.partialorder %v500_v30, 0.0 }
 0x24f   : > { %v995_v31 = vpop.eup %994 }
 0x250   : > { %v502_v32 = vmul.f32 %v995_v31, %v500_v30 }
 0x252   : > { %v504_v34 = vsel %vm503_vm6, %v500_v30, %v502_v32 }
 0x253   : > { %v507_v35 = vsel %vm505_vm7, %v506_v33, %v504_v34 }
 0x254   : > { %v509_v38 = vmul.f32 0.29552022, %v507_v35 }
 0x256   : > { %v510_v41 = vsub.f32 %v508_v37, %v509_v38 }
 0x258   : > { %v514_v43 = vsel %vm512_vm8, %v510_v41, %v812_v42 }
 0x259   : > { %v515_v45 = vmul.f32 15.0, %v514_v43 }
 0x25b   : > { %v525_v47 = vsel %vm493_vm5, %v515_v45, %v524_v44  ;;  %v533_v48 = vsel %vm1668_vm4, %v515_v45, 0.0 }
 0x25c   : > { %537 = vmax.xlane.f32.xlu1 %v525_v47  ;;  %v534_v49 = vadd.f32 %v533_v48, %v532_v46 }
 0x25e   : > { %536 = vst.msk [vmem:[#allocation4] sm:$0xff] %vm535_vm9, %v534_v49 }
 0x265   : > { %v568_v2 = vld [vmem:[#allocation4] sm:$0xff] (!%p815_p8) }
 0x2e9   : > { %v538_v51 = vpop.xlane.xlu1 %537 }
 0x2ea   : > { %v540_v52 = vmax.f32 %v539_v50, %v538_v51 }
 0x2ec   : > { %v542_v53 = vsub.f32 %v539_v50, %v540_v52  ;;  %558 = vst.msk [vmem:[#allocation2] sm:$0xff] %vm535_vm9, %v540_v52  ;;  %548 = vperm.xlu1 %985, %v540_v52  }
 0x2ee   : > { %v543_v58 = vmul.f32 1.442695, %v542_v53 }
 0x2f3   : > { %v566_v1 = vld [vmem:[#allocation2] sm:$0xff] (!%p815_p8) }
 0x2f4   : > { %vm573_vm10 = vcmp.ge.f32.partialorder (!%p815_p8), %v568_v2, %v566_v1 }
 0x2f5   : > { %v574_v4 = vsel (!%p815_p8), %vm573_vm10, 1.0, %v1302_v3 }
 0x2f6   : > { %575 = vst.msk [vmem:[%s369_s9] sm:$0xff] (!%p815_p8), %vm535_vm9, %v574_v4 }
 0x36b   : > { %v549_v54 = vpop.permute.xlu1 %548 }
 0x36c   : > { %v551_v55 = vsub.f32 %v525_v47, %v549_v54 }
 0x36e   : > { %v552_v56 = vmul.f32 1.442695, %v551_v55 }
 0x370   : > { %996 = vpow2.f32 %v552_v56 }
 0x371   : > { %998 = vpow2.f32 %v543_v58 }
 0x37a   : > { %v997_v57 = vpop.eup %996 }
 0x37b   : > { %554 = vadd.xlane.f32.xlu1 %v997_v57  ;;  %v999_v59 = vpop.eup %998 }
 0x37c   : > { %v545_v61 = vmul.f32 %v999_v59, %v541_v60 }
 0x405   : > { %562 = sbr.rel (%p815_p8) target bundleno = 1061 (0x425), region = 60 }
 0x408   : > { %v555_v62 = vpop.xlane.xlu1 %554 }
 0x409   : > { %v556_v63 = vadd.f32 %v555_v62, %v545_v61 }
 0x40b   : > { %557 = vst.msk [vmem:[#allocation3] sm:$0xff] %vm535_vm9, %v556_v63 }
 0x412   : > { %v563_v0 = vld [vmem:[#allocation3] sm:$0xff] }
 0x413   : > { %1000 = vlog2.f32 %v563_v0 }
 0x41d   : > { %v1001_v5 = vpop.eup %1000 }
 0x41e   : > { %v565_v6 = vmul.f32 0.6931472, %v1001_v5 }
 0x420   : > { %v567_v7 = vadd.f32 %v566_v1, %v565_v6 }
 0x422   : > { %v569_v8 = vsub.f32 %v567_v7, %v568_v2 }
 0x424   : > { %570 = vst.msk [vmem:[%s362_s6] sm:$0xff] %vm535_vm9, %v569_v8 }
 0x425 PF: > { %s818_s24 = sshll.u32 %s1276_s25, 7  ;;  %s1839_s4 = sld [smem:[#allocation31_spill]] }
 0x426   : > { %s595_s13 = sshll.u32 %s362_s6, 4  ;;  %s577_s7 = scalar_lea.sflag [#allocation7], %s1623_s17  ;;  %s596_s13 = int_to_ptr.vmem [resolvable:$true] %s595_s13 }
 0x427   : > { %s1122_s16 = scalar_lea.vmem %s596_s13, 128  ;;  %p1840_p1 = scmp.ne.s32.totalorder %s1824_s29, 0 }
 0x428   : > { %p1123_p10 = scmp.ne.s32.totalorder %s596_s13, %s1122_s16  ;;  %s1303_s10 = smov [#allocation13]  }
 0x429   : > { %s1126_s1 = sshll.u32 %s1303_s10, 4  ;;  %s1127_s1 = int_to_ptr.vmem [resolvable:$false] %s1126_s1 }
 0x42a   : > { %p1124_p0 = pnand %p1123_p10, %p1840_p1  ;;  %s1128_s18 = scalar_lea.vmem %s1127_s1, 256 }
 0x42b   : > { %s1699_s5 = scalar_lea.hbm %s1839_s4, %s818_s24  ;;  %p1129_p6 = scmp.lt.s32.totalorder %s596_s13, %s1127_s1 }
 0x42c   : > { %p1125_p7 = pneg %p1124_p0  ;;  %p1130_p4 = scmp.lt.s32.totalorder %s1128_s18, %s1122_s16 }
 0x42e   : > { %p1131_p2 = por %p1130_p4, %p1129_p6 }
 0x430   : > { %p1132_p11 = pnand %p1131_p2, %p1125_p7 }
 0x432   : > { %1135 = shalt.err (!%p1132_p11)
}
 0x433   : > { %s1136_s11 = scalar_lea.hbm %s1699_s5, 128  ;;  %s1140_s12 = scalar_lea.hbm %s1839_s4, 256 }
 0x434   : > { %p1137_p13 = scmp.ne.s32.totalorder %s1699_s5, %s1136_s11  ;;  %p1141_p12 = scmp.lt.u32.totalorder %s1699_s5, %s1839_s4 }
 0x435   : > { %p1142_p3 = scmp.lt.u32.totalorder %s1140_s12, %s1136_s11  ;;  %p1144_p10 = scmp.lt.u32.totalorder %s1136_s11, %s1699_s5 }
 0x436   : > { %p1138_p5 = pnand %p1137_p13, %p1840_p1 }
 0x437   : > { %p1143_p8 = por %p1142_p3, %p1141_p12 }
 0x438   : > { %p1139_p9 = pneg %p1138_p5 }
 0x439   : > { %p1145_p0 = por %p1144_p10, %p1143_p8 }
 0x43b   : > { %p1146_p7 = pnand %p1145_p0, %p1139_p9 }
 0x43d   : > { %1149 = shalt.err (!%p1146_p7)
}
 0x43e   : > { %861 = dma.vmem_to_hbm [thread:$0]  (%p1840_p1), %s596_s13, 128, %s1699_s5, %s577_s7  }
 0x43f   : > { %s1841_s21 = sld [smem:[#allocation32_spill]]  ;;  %s608_s1 = sshll.u32 %s369_s9, 4  ;;  %s609_s1 = int_to_ptr.vmem [resolvable:$true] %s608_s1 }
 0x440   : > { %s582_s18 = scalar_lea.sflag [#allocation15], %s1623_s17  ;;  %s1150_s11 = scalar_lea.vmem %s609_s1, 128 }
 0x441   : > { %p1151_p6 = scmp.ne.s32.totalorder %s609_s1, %s1150_s11  ;;  %s1304_s15 = smov [#allocation14]  }
 0x442   : > { %s1154_s14 = sshll.u32 %s1304_s15, 4  ;;  %s1155_s14 = int_to_ptr.vmem [resolvable:$false] %s1154_s14 }
 0x443   : > { %p1152_p4 = pnand %p1151_p6, %p1840_p1  ;;  %s1156_s12 = scalar_lea.vmem %s1155_s14, 256 }
 0x444   : > { %p1157_p11 = scmp.lt.s32.totalorder %s609_s1, %s1155_s14  ;;  %p1158_p13 = scmp.lt.s32.totalorder %s1156_s12, %s1150_s11 }
 0x445   : > { %s1842_s16 = smov %s1841_s21  ;;  %s1726_s10 = scalar_lea.hbm %s1841_s21, %s818_s24 }
 0x446   : > { %p1153_p2 = pneg %p1152_p4  ;;  %p1159_p5 = por %p1158_p13, %p1157_p11 }
 0x448   : > { %p1160_p9 = pnand %p1159_p5, %p1153_p2 }
 0x44a   : > { %1163 = shalt.err (!%p1160_p9)
}
 0x44b   : > { %s1164_s25 = scalar_lea.hbm %s1726_s10, 128  ;;  %s1168_s9 = scalar_lea.hbm %s1842_s16, 256 }
 0x44c   : > { %p1165_p12 = scmp.ne.s32.totalorder %s1726_s10, %s1164_s25  ;;  %p1169_p10 = scmp.lt.u32.totalorder %s1726_s10, %s1842_s16 }
 0x44d   : > { %p1170_p0 = scmp.lt.u32.totalorder %s1168_s9, %s1164_s25  ;;  %p1172_p6 = scmp.lt.u32.totalorder %s1164_s25, %s1726_s10 }
 0x44e   : > { %p1166_p3 = pnand %p1165_p12, %p1840_p1 }
 0x44f   : > { %p1171_p7 = por %p1170_p0, %p1169_p10 }
 0x450   : > { %p1167_p8 = pneg %p1166_p3 }
 0x451   : > { %p1173_p4 = por %p1172_p6, %p1171_p7 }
 0x453   : > { %p1174_p2 = pnand %p1173_p4, %p1167_p8 }
 0x455   : > { %1177 = shalt.err (!%p1174_p2)
}
 0x456   : > { %862 = dma.vmem_to_hbm [thread:$0]  (%p1840_p1), %s609_s1, 128, %s1726_s10, %s582_s18  }
 0x457 PF: > { %s1843_s13 = sld [smem:[#allocation23_spill]]  ;;  %s1844_s7 = sld [smem:[#allocation29_spill]] }
 0x458   : > { %p886_p11 = scmp.ge.s32.totalorder %s1288_s28, 2 }
 0x45d   : > { %s620_s6 = sand.u32 1, %s1843_s13   ;;  %p1845_p13 = scmp.ne.s32.totalorder %s1844_s7, 0 }
 0x45e   : > { %s621_s30 = scalar_lea.sflag [#allocation7], %s620_s6 }
 0x45f   : > { %p879_p5 = pnand %p886_p11, %p1845_p13 }
 0x461   : > { %1239 = dma.done.wait (!%p879_p5), %s621_s30, 128  }
 0x462   : > { %1241 = vsyncadd (!%p879_p5), %s621_s30, 4294967168  ;;  %s630_s20 = scalar_lea.sflag [#allocation15], %s620_s6 }
 0x463   : > { %1243 = dma.done.wait (!%p879_p5), %s630_s20, 128  }
 0x464   : > { %1245 = vsyncadd (!%p879_p5), %s630_s20, 4294967168  ;;  %s31_s28 = sadd.s32 1, %s1288_s28   ;;  %s1846_s29 = sld [smem:[#allocation22_spill]] }
 0x465   : > { %p28_p9 = scmp.ge.s32.totalorder %s31_s28, 8   ;;  %s1847_s20 = sld [smem:[#allocation26_spill]] }
 0x466   : > { %s1848_s23 = sld [smem:[#allocation24_spill]]  ;;  %s1849_s10 = sld [smem:[#allocation28_spill]] }
 0x467   : > { %s1850_s1 = sld [smem:[#allocation25_spill]]  ;;  %s1851_s11 = sld [smem:[#allocation27_spill]] }
 0x468   : > { %s1852_s18 = smov %s1252_s19  ;;  %s1854_s21 = smov %s1264_s22 }
 0x469   : > { %s1857_s24 = smov %s1280_s26  ;;  %s1858_s25 = smov %s1284_s27 }
 0x46a   : > { %s1853_s19 = smov %s1846_s29  ;;  %30 = sbr.rel (!%p28_p9) target bundleno = 19 (0x13), region = 143 }
 0x46c   : > { %s1855_s22 = smov %s1848_s23  ;;  %s1856_s23 = smov %s1849_s10 }
 0x46d   : > { %s1859_s26 = smov %s1850_s1  ;;  %s1860_s27 = smov %s1851_s11 }
 0x471   :  { %635 = vsyncpa [#allocation6], 1 }
 0x472   :  { %637 = vsyncpa [#allocation6 + $0x1], 1 }
 0x473   :  { %638 = vsyncpa [#allocation9], 1 }
 0x474   :  { %640 = vsyncpa [#allocation9 + $0x1], 1 }
 0x475   :  { %641 = vsyncpa [#allocation12], 1 }
 0x476   :  { %643 = vsyncpa [#allocation12 + $0x1], 1 }
 0x477   :  { %644 = vsyncpa [#allocation7], 1 }
 0x478   :  { %646 = vsyncpa [#allocation7 + $0x1], 1 }
 0x479   :  { %647 = vsyncpa [#allocation15], 1 }
 0x47a   :  { %649 = vsyncpa [#allocation15 + $0x1], 1 }

</bundles_post_ra>
